<compile_context>
chip_gen: v6e
topology: v6e:2x2x1
jax: 0.10.0
libtpu: 0.0.40
codegen_flags: <defaults>
</compile_context>

<pallas_src>
import jax
import jax.numpy as jnp
from jax.experimental import pallas as pl
from jax.experimental.pallas import tpu as pltpu

LATENT_DIM = 4
HIDDEN_DIM = 32
DEGREE_DIM = 1   # control_dim = 0 -> net input dim is DEGREE_DIM
BATCH = 8


# ---------------------------------------------------------------------------
# Host-side parameter packing: one f32 slab, one DMA.
#
# Slab layout ([8 + 2*H + L*L, H] rows, sublane(8)-aligned blocks):
#   row 0            : w1            [1, H]      (degree_dim == 1)
#   row 1            : b1            [1, H]
#   row 2            : b2            [1, H]
#   row 3, cols 0:L2 : b3            [1, L2]
#   rows 8      : 8+H    : w2        [H, H]
#   rows 8+H    : 8+2H   : w3        [H, L2]   (cols 0:L2)
#   rows 8+2H   : 8+2H+L2: S         [L2, L]   (cols 0:L), S[i*L+j, i] = 1
# ---------------------------------------------------------------------------
def pack_params(w1, b1, w2, b2, w3, b3, *, latent_dim, hidden_dim):
    L, H = latent_dim, hidden_dim
    L2 = L * L
    assert w1.shape == (DEGREE_DIM, H) and DEGREE_DIM == 1
    assert w2.shape == (H, H) and w3.shape == (H, L2)
    assert L2 <= H, "slab layout assumes latent_dim**2 <= hidden_dim"

    rows = 8 + 2 * H + L2                      # 88 for (L=4, H=32)
    P = jnp.zeros((rows, H), jnp.float32)
    P = P.at[0, :].set(w1.reshape(-1))
    P = P.at[1, :].set(b1.reshape(-1))
    P = P.at[2, :].set(b2.reshape(-1))
    P = P.at[3, :L2].set(b3.reshape(-1))
    P = P.at[8:8 + H, :].set(w2)
    P = P.at[8 + H:8 + 2 * H, :L2].set(w3)
    # Block-selection matrix: S[i*L + j, i] = 1  (kron(I_L, 1_L)).
    S = jnp.kron(jnp.eye(L, dtype=jnp.float32), jnp.ones((L, 1), jnp.float32))
    P = P.at[8 + 2 * H:8 + 2 * H + L2, :L].set(S)
    return P


def make_kernel(latent_dim, hidden_dim):
    L, H = latent_dim, hidden_dim
    L2 = L * L

    def kernel(q_ref, y_ref, p_ref, out_ref):
        q = q_ref[...]                                 # [TB, 1]
        y = y_ref[...]                                 # [TB, L]

        # Static views into the packed parameter slab (no extra DMAs).
        w1 = p_ref[0:1, :]                             # [1, H]
        b1 = p_ref[1:2, :]                             # [1, H]
        b2 = p_ref[2:3, :]                             # [1, H]
        b3 = p_ref[3:4, 0:L2]                          # [1, L2]
        w2 = p_ref[8:8 + H, :]                         # [H, H]
        w3 = p_ref[8 + H:8 + 2 * H, 0:L2]              # [H, L2]
        sel = p_ref[8 + 2 * H:8 + 2 * H + L2, 0:L]     # [L2, L]

        # --- MLP producing F_flat = net(q) ---------------------------------
        # Layer 1: contraction dim is 1 (degree_dim == 1, control_dim == 0),
        # so the matmul is exactly a VPU broadcast multiply.
        h1 = jnp.tanh(q * w1 + b1)                                     # [TB, H]
        h2 = jnp.tanh(jnp.dot(h1, w2,
                              preferred_element_type=jnp.float32) + b2)  # [TB, H]
        f_flat = (jnp.dot(h2, w3, preferred_element_type=jnp.float32)
                  + b3)                                                # [TB, L2]

        # --- batched mat-vec dy[b,i] = sum_j F[b,i,j] * y[b,j] --------------
        # Single MXU dot against the selection matrix instead of L lane
        # slices + L cross-lane reductions + a concat.
        y_tiled = jnp.tile(y, (1, L))                                  # [TB, L2]
        out_ref[...] = jnp.dot(f_flat * y_tiled, sel,
                               preferred_element_type=jnp.float32)     # [TB, L]

    return kernel


def mean_field_dynamics(t, y, q, packed_params, *,
                        latent_dim, hidden_dim, batch_tile=None):
    """JAX/Pallas equivalent of MeanFieldDynamics.forward(t, y, q) (u is None).

    `packed_params` is produced once by `pack_params` (do it outside the ODE
    loop). For large batches pass `batch_tile` (a multiple of 8 dividing B) to
    shard the batch grid across TensorCores and enable double-buffering.
    """
    del t  # time is not used by the PyTorch module's forward
    B, L = y.shape
    assert L == latent_dim
    TB = B if batch_tile is None else batch_tile
    assert B % TB == 0 and (TB % 8 == 0 or TB == B)

    kernel = make_kernel(latent_dim, hidden_dim)
    return pl.pallas_call(
        kernel,
        out_shape=jax.ShapeDtypeStruct((B, L), jnp.float32),
        grid_spec=pltpu.PrefetchScalarGridSpec(
            num_scalar_prefetch=0,
            grid=(B // TB,),
            in_specs=[
                pl.BlockSpec((TB, q.shape[1]), lambda i: (i, 0)),
                pl.BlockSpec((TB, L), lambda i: (i, 0)),
                # Parameter slab: one block, constant index -> DMA'd once and
                # kept resident across the batch grid.
                pl.BlockSpec(packed_params.shape, lambda i: (0, 0)),
            ],
            out_specs=pl.BlockSpec((TB, L), lambda i: (i, 0)),
        ),
        compiler_params=pltpu.CompilerParams(
            dimension_semantics=("parallel",)),
    )(q, y, packed_params)


if __name__ == "__main__":
    key = jax.random.PRNGKey(0)
    ks = jax.random.split(key, 8)

    def uinit(k, shape, fan_in):
        bound = 1.0 / (fan_in ** 0.5)
        return jax.random.uniform(k, shape, jnp.float32, -bound, bound)

    # Deterministic parameter init (PyTorch-Linear-style uniform bounds).
    w1 = uinit(ks[0], (DEGREE_DIM, HIDDEN_DIM), DEGREE_DIM)
    b1 = uinit(ks[1], (1, HIDDEN_DIM), DEGREE_DIM)
    w2 = uinit(ks[2], (HIDDEN_DIM, HIDDEN_DIM), HIDDEN_DIM)
    b2 = uinit(ks[3], (1, HIDDEN_DIM), HIDDEN_DIM)
    w3 = uinit(ks[4], (HIDDEN_DIM, LATENT_DIM * LATENT_DIM), HIDDEN_DIM)
    b3 = uinit(ks[5], (1, LATENT_DIM * LATENT_DIM), HIDDEN_DIM)

    # Pack parameters ONCE (outside any ODE integration loop).
    packed = pack_params(w1, b1, w2, b2, w3, b3,
                         latent_dim=LATENT_DIM, hidden_dim=HIDDEN_DIM)

    # Inputs: y is the latent state distribution ρ, q is the degree feature.
    y = jax.random.uniform(ks[6], (BATCH, LATENT_DIM), jnp.float32)
    y = y / jnp.sum(y, axis=-1, keepdims=True)        # ρ is a distribution
    q = jax.random.uniform(ks[7], (BATCH, DEGREE_DIM), jnp.float32)
    t = 0.0

    out = mean_field_dynamics(t, y, q, packed,
                              latent_dim=LATENT_DIM, hidden_dim=HIDDEN_DIM)
    out = jax.block_until_ready(out)

    # Pure-JAX reference for correctness.
    h1_ref = jnp.tanh(q @ w1 + b1)
    h2_ref = jnp.tanh(h1_ref @ w2 + b2)
    F_ref = (h2_ref @ w3 + b3).reshape(BATCH, LATENT_DIM, LATENT_DIM)
    dy_ref = jnp.einsum("bij,bj->bi", F_ref, y)
    assert out.shape == (BATCH, LATENT_DIM) and out.dtype == jnp.float32
    assert jnp.allclose(out, dy_ref, atol=1e-5, rtol=1e-5), "mismatch vs reference"

    print("KERNEL_OK")
</pallas_src>

<mosaic_0001>
module attributes {stable_mosaic.version = 11 : i64} {
  func.func @kernel(%arg0: i32, %arg1: memref<8x1xf32, #tpu.memory_space<vmem>>, %arg2: memref<8x4xf32, #tpu.memory_space<vmem>>, %arg3: memref<88x32xf32, #tpu.memory_space<vmem>>, %arg4: memref<8x4xf32, #tpu.memory_space<vmem>>) attributes {dimension_semantics = [#tpu.dimension_semantics<parallel>], iteration_bounds = array<i64: 1>, scalar_prefetch = 0 : i64, scratch_operands = 0 : i64, tpu.core_type = #tpu.core_type<tc>, window_params = [{transform_indices = @transform_0, window_bounds = array<i64: 8, 1>}, {transform_indices = @transform_1, window_bounds = array<i64: 8, 4>}, {pipeline_mode = #tpu.pipeline_mode<synchronous>, transform_indices = @transform_2, window_bounds = array<i64: 88, 32>}, {transform_indices = @transform_3, window_bounds = array<i64: 8, 4>}]} {
    %c0 = arith.constant 0 : index
    %c0_0 = arith.constant 0 : index
    %0 = vector.load %arg1[%c0, %c0_0] : memref<8x1xf32, #tpu.memory_space<vmem>>, vector<8x1xf32>
    %c0_1 = arith.constant 0 : index
    %c0_2 = arith.constant 0 : index
    %1 = vector.load %arg2[%c0_1, %c0_2] : memref<8x4xf32, #tpu.memory_space<vmem>>, vector<8x4xf32>
    %c0_3 = arith.constant 0 : index
    %c0_4 = arith.constant 0 : index
    %2 = vector.load %arg3[%c0_3, %c0_4] : memref<88x32xf32, #tpu.memory_space<vmem>>, vector<1x32xf32>
    %c1 = arith.constant 1 : index
    %c0_5 = arith.constant 0 : index
    %3 = vector.load %arg3[%c1, %c0_5] : memref<88x32xf32, #tpu.memory_space<vmem>>, vector<1x32xf32>
    %c2 = arith.constant 2 : index
    %c0_6 = arith.constant 0 : index
    %4 = vector.load %arg3[%c2, %c0_6] : memref<88x32xf32, #tpu.memory_space<vmem>>, vector<1x32xf32>
    %c3 = arith.constant 3 : index
    %c0_7 = arith.constant 0 : index
    %5 = vector.load %arg3[%c3, %c0_7] : memref<88x32xf32, #tpu.memory_space<vmem>>, vector<1x16xf32>
    %c8 = arith.constant 8 : index
    %c0_8 = arith.constant 0 : index
    %6 = vector.load %arg3[%c8, %c0_8] : memref<88x32xf32, #tpu.memory_space<vmem>>, vector<32x32xf32>
    %c40 = arith.constant 40 : index
    %c0_9 = arith.constant 0 : index
    %7 = vector.load %arg3[%c40, %c0_9] : memref<88x32xf32, #tpu.memory_space<vmem>>, vector<32x16xf32>
    %c72 = arith.constant 72 : index
    %c0_10 = arith.constant 0 : index
    %8 = vector.load %arg3[%c72, %c0_10] : memref<88x32xf32, #tpu.memory_space<vmem>>, vector<16x4xf32>
    %9 = vector.broadcast %0 : vector<8x1xf32> to vector<8x32xf32>
    %10 = vector.broadcast %2 : vector<1x32xf32> to vector<8x32xf32>
    %11 = arith.mulf %9, %10 : vector<8x32xf32>
    %12 = vector.broadcast %3 : vector<1x32xf32> to vector<8x32xf32>
    %13 = arith.addf %11, %12 : vector<8x32xf32>
    %14 = math.tanh %13 : vector<8x32xf32>
    %cst = arith.constant dense<0.000000e+00> : vector<8x32xf32>
    %15 = tpu.matmul %14, %6, %cst {dimension_numbers = #tpu.dot_dimension_numbers<[1], [0], [0], [1], [0, 0, 1, 1], [], []>} : vector<8x32xf32>, vector<32x32xf32>, vector<8x32xf32> -> vector<8x32xf32>
    %16 = vector.broadcast %4 : vector<1x32xf32> to vector<8x32xf32>
    %17 = arith.addf %15, %16 : vector<8x32xf32>
    %18 = math.tanh %17 : vector<8x32xf32>
    %cst_11 = arith.constant dense<0.000000e+00> : vector<8x16xf32>
    %19 = tpu.matmul %18, %7, %cst_11 {dimension_numbers = #tpu.dot_dimension_numbers<[1], [0], [0], [1], [0, 0, 1, 1], [], []>} : vector<8x32xf32>, vector<32x16xf32>, vector<8x16xf32> -> vector<8x16xf32>
    %20 = vector.broadcast %5 : vector<1x16xf32> to vector<8x16xf32>
    %21 = arith.addf %19, %20 : vector<8x16xf32>
    %22 = tpu.concatenate %1, %1, %1, %1 in 1 : vector<8x4xf32>, vector<8x4xf32>, vector<8x4xf32>, vector<8x4xf32> -> vector<8x16xf32>
    %23 = arith.mulf %21, %22 : vector<8x16xf32>
    %cst_12 = arith.constant dense<0.000000e+00> : vector<8x4xf32>
    %24 = tpu.matmul %23, %8, %cst_12 {dimension_numbers = #tpu.dot_dimension_numbers<[1], [0], [0], [1], [0, 0, 1, 1], [], []>} : vector<8x16xf32>, vector<16x4xf32>, vector<8x4xf32> -> vector<8x4xf32>
    %c0_13 = arith.constant 0 : index
    %c0_14 = arith.constant 0 : index
    %25 = vector.load %arg4[%c0_13, %c0_14] : memref<8x4xf32, #tpu.memory_space<vmem>>, vector<8x4xf32>
    tpu.vector_store %arg4[%c0_13, %c0_14], %24 {strides = array<i32>} : memref<8x4xf32, #tpu.memory_space<vmem>>, vector<8x4xf32>,
    return
  }
  func.func @transform_0(%arg0: i32) -> (i32, i32) {
    %c0_i32 = arith.constant 0 : i32
    %c0_i32_0 = arith.constant 0 : i32
    return %arg0, %c0_i32 : i32, i32
  }
  func.func @transform_1(%arg0: i32) -> (i32, i32) {
    %c0_i32 = arith.constant 0 : i32
    %c0_i32_0 = arith.constant 0 : i32
    return %arg0, %c0_i32 : i32, i32
  }
  func.func @transform_2(%arg0: i32) -> (i32, i32) {
    %c0_i32 = arith.constant 0 : i32
    %c0_i32_0 = arith.constant 0 : i32
    %c0_i32_1 = arith.constant 0 : i32
    return %c0_i32, %c0_i32_0 : i32, i32
  }
  func.func @transform_3(%arg0: i32) -> (i32, i32) {
    %c0_i32 = arith.constant 0 : i32
    %c0_i32_0 = arith.constant 0 : i32
    return %arg0, %c0_i32 : i32, i32
  }
}

</mosaic_0001>

<bundles_post_ra>
// kernel: tpu_custom_call.1
= control target key start
LH: loop header
LB: loop body
LE: loop exit
PB: predicated region body
PF: predicated region fallthrough
CT: control target
= control target key end

     0   :  { %v358_v0 = vmov 0   ;;  %v359_v3 = vmov 0.0   ;;  %vm360_vm0 = vmmov 0   ;;  %vm50_vm1 = vcmask 261120   ;;  %s361_s8 = smov 8   ;;  %s362_s9 = smov 4   ;;  %s442_s0 = inlined_call_operand.vmem [shape: f32[8,1], index: 0, kind: input, shape index: {}]   ;;  %s443_s2 = inlined_call_operand.vmem [shape: f32[88,32], index: 2, kind: input, shape index: {}]   ;;  %s444_s1 = inlined_call_operand.vmem [shape: f32[8,4], index: 1, kind: input, shape index: {}]   ;;  %s445_s3 = inlined_call_operand.vmem [shape: f32[8,4], index: 3, kind: output, shape index: {}]  }
   0x1   :  { %353 = vset.pattern.permute.xlu0 %v358_v0  ;;  %v14_v1 = vld [vmem:[%s442_s0] sm:$0xff]  ;;  %318 = vmatprep.subr.mxu0 %v359_v3  ;;  %v22_v4 = vld [vmem:[%s443_s2 + $0x18] sm:$0xff]  ;;  %v21_v5 = vld [vmem:[%s443_s2 + $0x10] sm:$0xff]  ;;  %s363_s10 = smov 12   ;;  %vm212_vm2 = vcmask 31744   ;;  %vm214_vm3 = vcmask 64512  }
   0x2   :  { %32 = vperm.xlu0 %353, %v14_v1   ;;  %v23_v2 = vld [vmem:[%s443_s2 + $0x20] sm:$0xff]  ;;  %326 = vmatprep.mubr.msk.f32.mxu0 %vm360_vm0, %v359_v3  ;;  %v20_v6 = vld [vmem:[%s443_s2 + $0x8] sm:$0xff]  ;;  %v26_v14 = vld [vmem:[%s443_s2 + $0x38] sm:$0xff]  ;;  %vm216_vm4 = vcmask 97280   ;;  %vm219_vm5 = vcmask 130048  }
   0x3   :  { %319 = vmatpush3.msra.mxu0 %v23_v2  ;;  %329 = vmatprep.subr.mxu1 %v359_v3  ;;  %v298_v7 = vld [vmem:[%s443_s2] ss:$0 sm:$0xff]  ;;  %v299_v8 = vld [vmem:[%s443_s2 + $0x1] ss:$0 sm:$0xff]  ;;  %v25_v15 = vld [vmem:[%s443_s2 + $0x30] sm:$0xff] }
   0x4   :  { %320 = vmatprep.subr.mxu0 %v359_v3  ;;  %337 = vmatprep.mubr.msk.f32.mxu1 %vm360_vm0, %v359_v3  ;;  %v27_v13 = vld [vmem:[%s443_s2 + $0x40] sm:$0xff]  ;;  %v24_v16 = vld [vmem:[%s443_s2 + $0x28] sm:$0xff]  ;;  %v29_v23 = vld [vmem:[%s443_s2 + $0x50] sm:$0xff] }
   0x5   :  { %321 = vmatpush3.msra.mxu0 %v22_v4  ;;  %330 = vmatpush3.msra.mxu1 %v27_v13  ;;  %v15_v17 = vld [vmem:[%s444_s1] sm:$0xff]  ;;  %v28_v24 = vld [vmem:[%s443_s2 + $0x48] sm:$0xff] }
   0x6   :  { %322 = vmatprep.subr.mxu0 %v359_v3  ;;  %331 = vmatprep.subr.mxu1 %v359_v3  ;;  %v300_v18 = vld [vmem:[%s443_s2 + $0x2] ss:$0 sm:$0xff]  ;;  %v302_v28 = vld [vmem:[%s443_s2 + $0x3] ss:$0 sm:$0xff] }
   0x7   :  { %323 = vmatpush3.msra.mxu0 %v21_v5  ;;  %332 = vmatpush3.msra.mxu1 %v26_v14 }
   0x8   :  { %324 = vmatprep.subr.mxu0 %v359_v3  ;;  %333 = vmatprep.subr.mxu1 %v359_v3 }
   0x9   :  { %325 = vmatpush3.msra.mxu0 %v20_v6  ;;  %334 = vmatpush3.msra.mxu1 %v25_v15 }
   0xa   :  { %340 = vmatprep.subr.mxu0 %v359_v3  ;;  %335 = vmatprep.subr.mxu1 %v359_v3 }
   0xb   :  { %336 = vmatpush3.msra.mxu1 %v24_v16  ;;  %206 = vrot.lane.b32.xlu1 %v15_v17, %s361_s8 }
   0xc   :  { %203 = vrot.lane.b32.xlu0 %v15_v17, %s362_s9 }
   0xf   :  { %209 = vrot.lane.b32.xlu1 %v15_v17, %s363_s10 }
  0x7d   :  { %v33_v9 = vpop.permute.xlu0 %32  ;;  %v207_v25 = vpop.permute.xlu1 %206 }
  0x7e   :  { %v39_v10 = vmul.f32 %v298_v7, %v33_v9 }
  0x80   :  { %v44_v11 = vadd.f32 %v299_v8, %v39_v10 }
  0x81   :  { %v204_v26 = vpop.permute.xlu0 %203  ;;  %v210_v29 = vpop.permute.xlu1 %209 }
  0x82   :  { %354 = vtanh.f32 %v44_v11  ;;  %v213_v27 = vsel %vm212_vm2, %v15_v17, %v204_v26 }
  0x83   :  { %v215_v30 = vsel %vm214_vm3, %v213_v27, %v207_v25 }
  0x84   :  { %v217_v33 = vsel %vm216_vm4, %v215_v30, %v210_v29 }
  0x8f   :  { %v355_v12 = vpop.eup %354 }
  0x90   :  { %327 = vmatmul.mubr.msk.f32.vlgmr.msra.gmra.mxu0 %vm50_vm1, %v355_v12 }
  0x91   :  { %344 = vmatprep.mubr.msk.f32.mxu0 %vm360_vm0, %v359_v3  ;;  %341 = vmatpush3.msra.mxu0 %v29_v23 }
  0x92   :  { %342 = vmatprep.subr.mxu0 %v359_v3 }
  0x93   :  { %343 = vmatpush3.msra.mxu0 %v28_v24 }
 0x150   :  { %v120_v19 = vpop.f32.mrf.mxu0 }
 0x151   :  { %v121_v20 = vadd.f32 %v300_v18, %v120_v19 }
 0x152   :  { %v328_v21 = vpop.f32.mrf.mxu0 }
 0x153   :  { %356 = vtanh.f32 %v121_v20 }
 0x160   :  { %v357_v22 = vpop.eup %356 }
 0x161   :  { %338 = vmatmul.mubr.msk.f32.vlgmr.msra.gmra.mxu1 %vm50_vm1, %v357_v22 }
 0x221   :  { %v198_v31 = vpop.f32.mrf.mxu1 }
 0x222   :  { %v199_v32 = vadd.f32 %v302_v28, %v198_v31 }
 0x223   :  { %v339_v34 = vpop.f32.mrf.mxu1 }
 0x224   :  { %v218_v35 = vmul.f32 %v217_v33, %v199_v32 }
 0x226   :  { %345 = vmatmul.mubr.msk.f32.vlgmr.msra.gmra.mxu0 %vm219_vm5, %v218_v35 }
 0x2e6   :  { %v289_v36 = vpop.f32.mrf.mxu0 }
 0x2e7   :  { %293 = vst.msk [vmem:[%s445_s3] sm:$0xff] %vm212_vm2, %v289_v36 }
 0x2e8   :  { %v346_v37 = vpop.f32.mrf.mxu0 }

</bundles_post_ra>
